<compile_context>
chip_gen: v6e
topology: v6e:2x2x1
jax: 0.10.0
libtpu: 0.0.40
codegen_flags: <defaults>
</compile_context>

<pallas_src>
import functools

import jax
import jax.numpy as jnp
from jax import lax
from jax.experimental import pallas as pl
from jax.experimental.pallas import tpu as pltpu


def _setblock_conv_kernel(x_ref, w_ref, o_ref, *, KH, Ho, sh):
    """One grid step = F frames.

    x_ref : (F, Hp, W*Cin)        row-padded, lane-flattened frames (bf16, VMEM)
    w_ref : (KH, W*Cin, Wo*Cout)  banded (Toeplitz) weight, lane-dense N   (bf16, VMEM)
    o_ref : (F, Ho, Wo*Cout)      lane-dense output block
    """
    F, Hp, K = x_ref.shape
    N = w_ref.shape[-1]

    x = x_ref[...]                                     # (F, Hp, K)
    acc = jnp.zeros((F * Ho, N), dtype=jnp.float32)
    for kh in range(KH):                               # KH tiny; fully unrolled
        if sh == 1:
            rows = lax.slice(x, (0, kh, 0), (F, kh + Ho, K))
        else:
            # TODO(synk): strided sublane gather is slow for sh > 1; rework before use.
            rows = lax.slice(x, (0, kh, 0), (F, kh + (Ho - 1) * sh + 1, K), (1, sh, 1))
        rows = rows.reshape(F * Ho, K)                 # Ho multiple of 8 -> layout-free
        acc = acc + jnp.dot(rows, w_ref[kh], preferred_element_type=jnp.float32)
    o_ref[...] = acc.reshape(F, Ho, N).astype(o_ref.dtype)


def _choose_frames_per_step(NS, per_frame_bytes, target_bytes=2 << 20):
    """Largest divisor of NS with per-step footprint <= target, keeping grid >= 2 (v7x)."""
    cap = max(1, target_bytes // max(per_frame_bytes, 1))
    best = 1
    for f in range(1, NS + 1):
        if NS % f:
            continue
        if f > cap:
            break
        if NS >= 2 and NS // f < 2:
            break
        best = f
    return best


def _toeplitz_weight(weight_oihw, W, Wo, sw, pw, dtype):
    """Fold the KW taps and horizontal padding into a banded (W*Cin, Wo*Cout) matrix per kh.

    W_toep[kh, w_in*Cin + ci, wo*Cout + co] = weight[co, ci, kh, w_in + pw - wo*sw]
                                              (0 where the tap index falls outside [0, KW)).
    """
    Cout, Cin, KH, KW = weight_oihw.shape
    w_hwio = jnp.transpose(weight_oihw, (2, 3, 1, 0)).astype(dtype)       # (KH,KW,Cin,Cout)
    w_in = jnp.arange(W)
    wo = jnp.arange(Wo)
    kw = w_in[:, None] + pw - wo[None, :] * sw                             # (W, Wo)
    valid = (kw >= 0) & (kw < KW)
    kw_c = jnp.clip(kw, 0, KW - 1)
    toep = w_hwio[:, kw_c]                                                 # (KH,W,Wo,Cin,Cout)
    toep = toep * valid[None, :, :, None, None].astype(dtype)
    toep = jnp.transpose(toep, (0, 1, 3, 2, 4))                            # (KH,W,Cin,Wo,Cout)
    return toep.reshape(KH, W * Cin, Wo * Cout)


@functools.partial(jax.jit, static_argnames=("stride", "padding"))
def set_block_conv2d(x_ncshw, weight_oihw, stride=1, padding=1):
    """SetBlockWrapper(BasicConv2d) forward: [n, c_in, s, h, w] -> [n, c_out, s, h', w']."""
    sh, sw = (stride, stride) if isinstance(stride, int) else tuple(stride)
    ph, pw = (padding, padding) if isinstance(padding, int) else tuple(padding)

    n, Cin, s, H, W = x_ncshw.shape
    Cout, Cin_w, KH, KW = weight_oihw.shape
    assert Cin == Cin_w
    NS = n * s
    Hp = H + 2 * ph
    Ho = (Hp - KH) // sh + 1
    Wo = (W + 2 * pw - KW) // sw + 1
    K = W * Cin            # contraction width per kh (horizontal pad folded into the weight)
    N = Wo * Cout          # lane-dense output width (128 here -> unmasked vst)
    out_dtype = x_ncshw.dtype
    out_isize = jnp.dtype(out_dtype).itemsize
    compute_dtype = jnp.bfloat16   # bf16 operands, f32 accumulation (documented deviation)

    # --- producer glue: transpose + cast + vertical pad (fused by XLA into one pass) ---
    xf = jnp.transpose(x_ncshw, (0, 2, 3, 4, 1)).reshape(NS, H, K).astype(compute_dtype)
    xf = jnp.pad(xf, ((0, 0), (ph, ph), (0, 0)))                           # (NS, Hp, W*Cin)

    w_toep = _toeplitz_weight(weight_oihw, W, Wo, sw, pw, compute_dtype)   # (KH, K, N)

    # --- batch F frames per grid step; keep grid >= 2 for v7x's two TensorCores ---
    per_frame = Hp * K * 2 + Ho * N * out_isize + Ho * N * 4 + KH * Ho * K * 2
    F = _choose_frames_per_step(NS, per_frame)

    # --- VMEM budget from actual double-buffered block sizes (+ Mosaic headroom) ---
    in_blk = F * Hp * K * 2
    out_blk = F * Ho * N * out_isize
    w_blk = KH * K * N * 2
    acc_blk = F * Ho * N * 4
    rows_blk = KH * F * Ho * K * 2
    vmem_limit = min(2 * in_blk + 2 * out_blk + 2 * w_blk + acc_blk + rows_blk + (4 << 20),
                     64 << 20)

    out = pl.pallas_call(
        functools.partial(_setblock_conv_kernel, KH=KH, Ho=Ho, sh=sh),
        out_shape=jax.ShapeDtypeStruct((NS, Ho, N), out_dtype),
        grid_spec=pltpu.PrefetchScalarGridSpec(
            num_scalar_prefetch=0,
            grid=(NS // F,),
            in_specs=[
                pl.BlockSpec((F, Hp, K), lambda i: (i, 0, 0)),
                pl.BlockSpec((KH, K, N), lambda i: (0, 0, 0)),
            ],
            out_specs=pl.BlockSpec((F, Ho, N), lambda i: (i, 0, 0)),
        ),
        compiler_params=pltpu.CompilerParams(
            dimension_semantics=("parallel",),
            vmem_limit_bytes=int(vmem_limit),
        ),
    )(xf, w_toep)

    # [NS, Ho, Wo*Cout] -> [n, s, Ho, Wo, Cout] -> [n, Cout, s, Ho, Wo]
    out = out.reshape(n, s, Ho, Wo, Cout)
    return jnp.transpose(out, (0, 4, 1, 2, 3))


if __name__ == "__main__":
    # SetBlockWrapper(BasicConv2d(in_channels=4, out_channels=8, kernel=3, stride=1, pad=1))
    n, c, s, h, w = 2, 4, 8, 16, 16
    Cout, KH, KW = 8, 3, 3
    stride, padding = 1, 1

    key = jax.random.PRNGKey(0)
    kx, kw_ = jax.random.split(key)
    x = jax.random.normal(kx, (n, c, s, h, w), dtype=jnp.float32)
    weight = jax.random.normal(kw_, (Cout, c, KH, KW), dtype=jnp.float32) * 0.1

    y = set_block_conv2d(x, weight, stride, padding)
    y = jax.block_until_ready(y)
    assert y.shape == (n, Cout, s, h, w), y.shape

    # Reference: f32 XLA conv on the same bf16-rounded operands (kernel uses bf16 MXU
    # operands with f32 accumulation), applied frame-wise exactly as SetBlockWrapper does.
    x_r = x.astype(jnp.bfloat16).astype(jnp.float32)
    w_r = weight.astype(jnp.bfloat16).astype(jnp.float32)
    x_frames_nchw = jnp.transpose(x_r, (0, 2, 1, 3, 4)).reshape(n * s, c, h, w)
    y_ref_frames = jax.lax.conv_general_dilated(
        x_frames_nchw, w_r,
        window_strides=(stride, stride),
        padding=((padding, padding), (padding, padding)),
        dimension_numbers=("NCHW", "OIHW", "NCHW"),
        precision=jax.lax.Precision.HIGHEST,
    )
    y_ref = jnp.transpose(y_ref_frames.reshape(n, s, Cout, h, w), (0, 2, 1, 3, 4))

    assert jnp.allclose(y, y_ref, atol=1e-2, rtol=1e-2), float(jnp.max(jnp.abs(y - y_ref)))

    print("KERNEL_OK")
</pallas_src>

<mosaic_0001>
module attributes {stable_mosaic.version = 11 : i64} {
  func.func @_setblock_conv_kernel(%arg0: i32, %arg1: memref<8x18x64xbf16, #tpu.memory_space<vmem>>, %arg2: memref<3x64x128xbf16, #tpu.memory_space<vmem>>, %arg3: memref<8x16x128xf32, #tpu.memory_space<vmem>>) attributes {dimension_semantics = [#tpu.dimension_semantics<parallel>], iteration_bounds = array<i64: 2>, scalar_prefetch = 0 : i64, scratch_operands = 0 : i64, tpu.core_type = #tpu.core_type<tc>, window_params = [{transform_indices = @transform_0, window_bounds = array<i64: 8, 18, 64>}, {pipeline_mode = #tpu.pipeline_mode<synchronous>, transform_indices = @transform_1, window_bounds = array<i64: 3, 64, 128>}, {transform_indices = @transform_2, window_bounds = array<i64: 8, 16, 128>}]} {
    %c0 = arith.constant 0 : index
    %c0_0 = arith.constant 0 : index
    %c0_1 = arith.constant 0 : index
    %0 = vector.load %arg1[%c0, %c0_0, %c0_1] : memref<8x18x64xbf16, #tpu.memory_space<vmem>>, vector<8x18x64xbf16>
    %cst = arith.constant 0.000000e+00 : f32
    %1 = vector.broadcast %cst : f32 to vector<128x128xf32>
    %2 = vector.extract_strided_slice %0 {offsets = [0, 0, 0], sizes = [8, 16, 64], strides = [1, 1, 1]} : vector<8x18x64xbf16> to vector<8x16x64xbf16>
    %3 = vector.shape_cast %2 : vector<8x16x64xbf16> to vector<128x64xbf16>
    %c0_2 = arith.constant 0 : index
    %c0_3 = arith.constant 0 : index
    %c0_4 = arith.constant 0 : index
    %4 = vector.load %arg2[%c0_2, %c0_3, %c0_4] : memref<3x64x128xbf16, #tpu.memory_space<vmem>>, vector<1x64x128xbf16>
    %5 = vector.shape_cast %4 : vector<1x64x128xbf16> to vector<64x128xbf16>
    %cst_5 = arith.constant dense<0.000000e+00> : vector<128x128xf32>
    %6 = tpu.matmul %3, %5, %cst_5 {dimension_numbers = #tpu.dot_dimension_numbers<[1], [0], [0], [1], [0, 0, 1, 1], [], []>} : vector<128x64xbf16>, vector<64x128xbf16>, vector<128x128xf32> -> vector<128x128xf32>
    %7 = arith.addf %1, %6 : vector<128x128xf32>
    %8 = vector.extract_strided_slice %0 {offsets = [0, 1, 0], sizes = [8, 16, 64], strides = [1, 1, 1]} : vector<8x18x64xbf16> to vector<8x16x64xbf16>
    %9 = vector.shape_cast %8 : vector<8x16x64xbf16> to vector<128x64xbf16>
    %c1 = arith.constant 1 : index
    %c0_6 = arith.constant 0 : index
    %c0_7 = arith.constant 0 : index
    %10 = vector.load %arg2[%c1, %c0_6, %c0_7] : memref<3x64x128xbf16, #tpu.memory_space<vmem>>, vector<1x64x128xbf16>
    %11 = vector.shape_cast %10 : vector<1x64x128xbf16> to vector<64x128xbf16>
    %cst_8 = arith.constant dense<0.000000e+00> : vector<128x128xf32>
    %12 = tpu.matmul %9, %11, %cst_8 {dimension_numbers = #tpu.dot_dimension_numbers<[1], [0], [0], [1], [0, 0, 1, 1], [], []>} : vector<128x64xbf16>, vector<64x128xbf16>, vector<128x128xf32> -> vector<128x128xf32>
    %13 = arith.addf %7, %12 : vector<128x128xf32>
    %14 = vector.extract_strided_slice %0 {offsets = [0, 2, 0], sizes = [8, 16, 64], strides = [1, 1, 1]} : vector<8x18x64xbf16> to vector<8x16x64xbf16>
    %15 = vector.shape_cast %14 : vector<8x16x64xbf16> to vector<128x64xbf16>
    %c2 = arith.constant 2 : index
    %c0_9 = arith.constant 0 : index
    %c0_10 = arith.constant 0 : index
    %16 = vector.load %arg2[%c2, %c0_9, %c0_10] : memref<3x64x128xbf16, #tpu.memory_space<vmem>>, vector<1x64x128xbf16>
    %17 = vector.shape_cast %16 : vector<1x64x128xbf16> to vector<64x128xbf16>
    %cst_11 = arith.constant dense<0.000000e+00> : vector<128x128xf32>
    %18 = tpu.matmul %15, %17, %cst_11 {dimension_numbers = #tpu.dot_dimension_numbers<[1], [0], [0], [1], [0, 0, 1, 1], [], []>} : vector<128x64xbf16>, vector<64x128xbf16>, vector<128x128xf32> -> vector<128x128xf32>
    %19 = arith.addf %13, %18 : vector<128x128xf32>
    %20 = vector.shape_cast %19 : vector<128x128xf32> to vector<8x16x128xf32>
    %c0_12 = arith.constant 0 : index
    %c0_13 = arith.constant 0 : index
    %c0_14 = arith.constant 0 : index
    %21 = vector.load %arg3[%c0_12, %c0_13, %c0_14] : memref<8x16x128xf32, #tpu.memory_space<vmem>>, vector<8x16x128xf32>
    tpu.vector_store %arg3[%c0_12, %c0_13, %c0_14], %20 {strides = array<i32>} : memref<8x16x128xf32, #tpu.memory_space<vmem>>, vector<8x16x128xf32>,
    return
  }
  func.func @transform_0(%arg0: i32) -> (i32, i32, i32) {
    %c0_i32 = arith.constant 0 : i32
    %c0_i32_0 = arith.constant 0 : i32
    %c0_i32_1 = arith.constant 0 : i32
    return %arg0, %c0_i32, %c0_i32_0 : i32, i32, i32
  }
  func.func @transform_1(%arg0: i32) -> (i32, i32, i32) {
    %c0_i32 = arith.constant 0 : i32
    %c0_i32_0 = arith.constant 0 : i32
    %c0_i32_1 = arith.constant 0 : i32
    %c0_i32_2 = arith.constant 0 : i32
    return %c0_i32, %c0_i32_0, %c0_i32_1 : i32, i32, i32
  }
  func.func @transform_2(%arg0: i32) -> (i32, i32, i32) {
    %c0_i32 = arith.constant 0 : i32
    %c0_i32_0 = arith.constant 0 : i32
    %c0_i32_1 = arith.constant 0 : i32
    return %arg0, %c0_i32, %c0_i32_0 : i32, i32, i32
  }
}

</mosaic_0001>

<bundles_post_ra>
// kernel: set_block_conv2d.1
= control target key start
LH: loop header
LB: loop body
LE: loop exit
PB: predicated region body
PF: predicated region fallthrough
CT: control target
= control target key end

     0   :  { %s1344_s9 = smov 0   ;;  %s1708_s0 = inlined_call_operand.vmem [shape: bf16[16,18,64], index: 0, kind: input, shape index: {}]   ;;  %s1709_s1 = inlined_call_operand.vmem [shape: bf16[3,64,128], index: 1, kind: input, shape index: {}]   ;;  %s1710_s2 = inlined_call_operand.vmem [shape: f32[16,16,128], index: 2, kind: output, shape index: {}]  }
   0x1 LB: > { %s1079_s10 = sadd.s32 4294967295, %s1327_s9   ;;  %p1083_p0 = scmp.ge.s32.totalorder %s1327_s9, 1  ;;  %s1327_s9 = sphi %s1344_s9, %s12_s9  }
   0x2   : > { %p114_p1 = scmp.lt.s32.totalorder %s1327_s9, 3 }
   0x4   : > { %p115_p2 = pnand %p1083_p0, %p114_p1 }
   0x5   : > { %s1084_s13 = sshll.u32 (!%p115_p2), %s1079_s10, 3 }
   0x6   : > { %118 = sbr.rel (%p115_p2) target bundleno = 292 (0x124), region = 28  ;;  %p139_p3 = scmp.lt.s32.totalorder (!%p115_p2), %s1084_s13, 15 }
   0xb   : > { %v1301_v0 = vld [vmem:[%s1709_s1 + $0x38] sm:$0xff]   ;;  %v1302_v1 = vld [vmem:[%s1709_s1 + $0x30] sm:$0xff]   ;;  %s1716_s13 = smov (!%p139_p3, %s1084_s13), 15  ;;  %v1303_v2 = vld [vmem:[%s1709_s1 + $0x28] sm:$0xff]   ;;  %vm185_vm0 = vsmask.f32 3328 }
   0xc   : > { %1284 = vmatprep.subr.bf16.mxu1 %v1301_v0  ;;  %1212 = vmatprep.subr.bf16.mxu0 %v1301_v0  ;;  %s1292_s18 = smul.u32 12, %s1716_s13  ;;  %v1304_v3 = vld [vmem:[%s1709_s1 + $0x20] sm:$0xff]   ;;  %vm186_vm1 = vsmask.f32 7440  ;;  %v1401_v23 = vld [vmem:[%s1709_s1 + $0x18] sm:$0xff]   ;;  %vm437_vm3 = vcmask 523264  }
   0xd   : > { %1288 = vmatpush3.bf16.msra.mxu1 %v1301_v0  ;;  %1213 = vmatpush3.bf16.msra.mxu0 %v1301_v0  ;;  %v1406_v24 = vld [vmem:[%s1709_s1 + $0x58] sm:$0xff]   ;;  %vm1418_vm2 = vmor %vm185_vm0, %vm186_vm1  ;;  %vm752_vm4 = vcmask 1042432   ;;  %vm753_vm5 = vcmask 1046532   ;;  %s1175_s14 = sshll.u32 %s1716_s13, 4 }
   0xe   : > { %1285 = vmatprep.subr.bf16.mxu1 %v1302_v1  ;;  %1214 = vmatprep.subr.bf16.mxu0 %v1302_v1  ;;  %s1370_s23 = scalar_lea.vmem %s1708_s0, %s1292_s18  ;;  %vm1555_vm6 = vmor %vm752_vm4, %vm753_vm5  ;;  %s1680_s17 = scalar_lea.vmem %s1710_s2, %s1175_s14 }
   0xf   : > { %v1373_v4 = vld [vmem:[%s1370_s23] sm:$0xf]  ;;  %v1376_v5 = vld [vmem:[%s1370_s23 + $0x4] sm:$0xf]  ;;  %v1379_v6 = vld [vmem:[%s1370_s23 + $0x8] sm:$0x1] }
  0x10   : > { %v189_v7 = vshrl.u32 %v1373_v4, 16  ;;  %v192_v8 = vshll.u32 %v1373_v4, 16  ;;  %v198_v9 = vshll.u32 %v1376_v5, 16  ;;  %v202_v10 = vshrl.u32 %v1376_v5, 16  ;;  %v1386_v11 = vld [vmem:[%s1370_s23 + $0x30] sm:$0xf] }
  0x11   : > { %1289 = vmatpush3.bf16.msra.mxu1 %v1302_v1  ;;  %1215 = vmatpush3.bf16.msra.mxu0 %v1302_v1  ;;  %v208_v12 = vshll.u32 %v1379_v6, 16  ;;  %v1390_v13 = vld [vmem:[%s1370_s23 + $0x34] sm:$0xf]  ;;  %v1393_v14 = vld [vmem:[%s1370_s23 + $0x38] sm:$0x1]  ;;  %v285_v20 = vshrl.u32 %v1386_v11, 16 }
  0x12   : > { %1286 = vmatprep.subr.bf16.mxu1 %v1303_v2  ;;  %1216 = vmatprep.subr.bf16.mxu0 %v1303_v2  ;;  %v191_v15 = vrot.slane %v189_v7, 4  ;;  %v194_v16 = vrot.slane %v192_v8, 5  ;;  %v200_v17 = vrot.slane %v198_v9, 5  ;;  %v204_v18 = vrot.slane %v202_v10, 4  ;;  %v1411_v29 = vld [vmem:[%s1370_s23 + $0xc] sm:$0xf] }
  0x13   : > { %v210_v19 = vrot.slane %v208_v12, 5  ;;  %v288_v21 = vshll.u32 %v1386_v11, 16  ;;  %v294_v22 = vshll.u32 %v1390_v13, 16  ;;  %v298_v27 = vshrl.u32 %v1390_v13, 16  ;;  %v1414_v30 = vld [vmem:[%s1370_s23 + $0x10] sm:$0xf] }
  0x14   : > { %v195_v25 = vor.u32 %v194_v16, %v191_v15  ;;  %v205_v26 = vor.u32 %v204_v18, %v200_v17  ;;  %v304_v28 = vshll.u32 %v1393_v14, 16  ;;  %v287_v32 = vrot.slane %v285_v20, 4  ;;  %v1423_v39 = vld [vmem:[%s1370_s23 + $0x14] sm:$0x1]  ;;  %v1436_v52 = vld [vmem:[%s1370_s23 + $0x3c] sm:$0xf] }
  0x15   : > { %1290 = vmatpush3.bf16.msra.mxu1 %v1303_v2  ;;  %1217 = vmatpush3.bf16.msra.mxu0 %v1303_v2  ;;  %v290_v33 = vrot.slane %v288_v21, 5  ;;  %v296_v34 = vrot.slane %v294_v22, 5  ;;  %v300_v37 = vrot.slane %v298_v27, 4  ;;  %v213_v41 = vshrl.u32 %v1411_v29, 16  ;;  %v1440_v57 = vld [vmem:[%s1370_s23 + $0x40] sm:$0xf] }
  0x16   : > { %1287 = vmatprep.subr.bf16.mxu1 %v1304_v3  ;;  %1218 = vmatprep.subr.bf16.mxu0 %v1304_v3  ;;  %v196_v35 = vrot.slane %v195_v25, 4  ;;  %v206_v36 = vrot.slane %v205_v26, 4  ;;  %v306_v38 = vrot.slane %v304_v28, 5  ;;  %v216_v42 = vshll.u32 %v1411_v29, 16  ;;  %v1448_v62 = vld [vmem:[%s1370_s23 + $0x44] sm:$0x1] }
  0x17   : > { %v291_v40 = vor.u32 %v290_v33, %v287_v32  ;;  %v222_v43 = vshll.u32 %v1414_v30, 16  ;;  %v301_v46 = vor.u32 %v300_v37, %v296_v34  ;;  %v226_v47 = vshrl.u32 %v1414_v30, 16  ;;  %v1461_v18 = vld [vmem:[%s1370_s23 + $0x1c] sm:$0xf]  ;;  %v1467_v22 = vld [vmem:[%s1370_s23 + $0x20] sm:$0x1] }
  0x18   : > { %v201_v44 = vsel %vm1418_vm2, %v196_v35, %v200_v17  ;;  %v211_v45 = vsel %vm1418_vm2, %v206_v36, %v210_v19  ;;  %v215_v50 = vrot.slane %v213_v41, 4  ;;  %v218_v51 = vrot.slane %v216_v42, 5  ;;  %v1474_v33 = vld [vmem:[%s1370_s23 + $0x48] sm:$0xf]  ;;  %v1308_v36 = vld [vmem:[%s1709_s1 + $0x50] sm:$0xff]  }
  0x19   : > { %1291 = vmatpush3.bf16.msra.mxu1 %v1304_v3  ;;  %1219 = vmatpush3.bf16.msra.mxu0 %v1304_v3  ;;  %v1097_v48 = vcombine.low %v201_v44, %v211_v45  ;;  %v292_v49 = vrot.slane %v291_v40, 4  ;;  %v302_v53 = vrot.slane %v301_v46, 4  ;;  %v224_v54 = vrot.slane %v222_v43, 5  ;;  %v1454_v3 = vld [vmem:[%s1370_s23 + $0x18] sm:$0xf] }
  0x1a   : > { %1236 = vmatprep.subr.bf16.mxu1 %v1401_v23  ;;  %1260 = vmatprep.subr.bf16.mxu0 %v1406_v24  ;;  %v228_v55 = vrot.slane %v226_v47, 4  ;;  %v232_v56 = vshll.u32 %v1423_v39, 16  ;;  %v760_v58 = vrot.slane %v1379_v6, 5  ;;  %v219_v60 = vor.u32 %v218_v51, %v215_v50  ;;  %v1481_v40 = vld [vmem:[%s1370_s23 + $0x4c] sm:$0xf] }
  0x1b   : > { %1220 = vmatprep.mubr.msk.bf16.mxu0 %vm437_vm3, %v1097_v48  ;;  %v297_v59 = vsel %vm1418_vm2, %v292_v49, %v296_v34  ;;  %v764_v61 = vrot.slane %v1414_v30, 5  ;;  %v307_v63 = vsel %vm1418_vm2, %v302_v53, %v306_v38  ;;  %v309_v2 = vshrl.u32 %v1436_v52, 16  ;;  %v1486_v45 = vld [vmem:[%s1370_s23 + $0x50] sm:$0x1]  ;;  %v1492_v50 = vld [vmem:[%s1370_s23 + $0x24] sm:$0xf] }
  0x1c   : > { %v229_v0 = vor.u32 %v228_v55, %v224_v54  ;;  %v234_v1 = vrot.slane %v232_v56, 5  ;;  %v1101_v7 = vcombine.low %v297_v59, %v307_v63  ;;  %v220_v8 = vrot.slane %v219_v60, 4  ;;  %v1496_v56 = vld [vmem:[%s1370_s23 + $0x28] sm:$0xf] }
  0x1d   : > { %v312_v9 = vshll.u32 %v1436_v52, 16  ;;  %v318_v10 = vshll.u32 %v1440_v57, 16  ;;  %v311_v15 = vrot.slane %v309_v2, 4  ;;  %v322_v16 = vshrl.u32 %v1440_v57, 16 }
  0x1e   : > { %v230_v12 = vrot.slane %v229_v0, 4  ;;  %v328_v17 = vshll.u32 %v1448_v62, 16  ;;  %1228 = vmatprep.mubr.msk.bf16.mxu1 %vm437_vm3, %v1101_v7  ;;  %v225_v19 = vsel %vm1418_vm2, %v220_v8, %v224_v54  ;;  %v237_v25 = vshrl.u32 %v1454_v3, 16 }
  0x1f   : > { %v314_v20 = vrot.slane %v312_v9, 5  ;;  %v320_v21 = vrot.slane %v318_v10, 5  ;;  %v324_v27 = vrot.slane %v322_v16, 4  ;;  %v240_v32 = vshll.u32 %v1454_v3, 16  ;;  %v1307_v10 = vld [vmem:[%s1709_s1 + $0x10] sm:$0xff]  }
  0x20   : > { %v235_v26 = vsel %vm1418_vm2, %v230_v12, %v234_v1  ;;  %v330_v28 = vrot.slane %v328_v17, 5  ;;  %v239_v37 = vrot.slane %v237_v25, 4  ;;  %v246_v38 = vshll.u32 %v1461_v18, 16  ;;  %v1310_v1 = vld [vmem:[%s1709_s1 + $0x48] sm:$0xff]  }
  0x21   : > { %v1098_v34 = vcombine.low %v225_v19, %v235_v26  ;;  %v315_v35 = vor.u32 %v314_v20, %v311_v15  ;;  %v325_v41 = vor.u32 %v324_v27, %v320_v21  ;;  %v242_v42 = vrot.slane %v240_v32, 5  ;;  %v1312_v26 = vld [vmem:[%s1709_s1 + $0x40] sm:$0xff]  }
  0x22   : > { %v250_v43 = vshrl.u32 %v1461_v18, 16  ;;  %v256_v44 = vshll.u32 %v1467_v22, 16  ;;  %v248_v47 = vrot.slane %v246_v38, 5  ;;  %v333_v48 = vshrl.u32 %v1474_v33, 16 }
  0x23   : > { %1221 = vmatmul.mubr.msk.bf16.vlgmr.msra.gmra.mxu0 %vm437_vm3, %v1098_v34  ;;  %v316_v46 = vrot.slane %v315_v35, 4  ;;  %v336_v49 = vshll.u32 %v1474_v33, 16  ;;  %v326_v51 = vrot.slane %v325_v41, 4  ;;  %v243_v53 = vor.u32 %v242_v42, %v239_v37  ;;  %v1524_v35 = vld [vmem:[%s1370_s23 + $0x54] sm:$0xf] }
  0x24   : > { %1261 = vmatpush3.bf16.msra.mxu0 %v1406_v24  ;;  %v252_v54 = vrot.slane %v250_v43, 4  ;;  %v258_v55 = vrot.slane %v256_v44, 5  ;;  %v335_v60 = vrot.slane %v333_v48, 4  ;;  %v342_v0 = vshll.u32 %v1481_v40, 16  ;;  %v1531_v42 = vld [vmem:[%s1370_s23 + $0x58] sm:$0xf] }
  0x25   : > { %v321_v59 = vsel %vm1418_vm2, %v316_v46, %v320_v21  ;;  %1262 = vmatprep.subr.bf16.mxu0 %v1308_v36  ;;  %v338_v63 = vrot.slane %v336_v49, 5  ;;  %v331_v24 = vsel %vm1418_vm2, %v326_v51, %v330_v28  ;;  %v244_v2 = vrot.slane %v243_v53, 4  ;;  %v1514_v21 = vld [vmem:[%s1370_s23 + $0x2c] sm:$0x1] }
  0x26   : > { %v253_v7 = vor.u32 %v252_v54, %v248_v47  ;;  %v346_v8 = vshrl.u32 %v1481_v40, 16  ;;  %v1102_v9 = vcombine.low %v321_v59, %v331_v24  ;;  %v344_v15 = vrot.slane %v342_v0, 5  ;;  %v1309_v46 = vld [vmem:[%s1709_s1 + $0x8] sm:$0xff]  }
  0x27   : > { %v339_v12 = vor.u32 %v338_v63, %v335_v60  ;;  %v352_v16 = vshll.u32 %v1486_v45, 16  ;;  %v249_v17 = vsel %vm1418_vm2, %v244_v2, %v248_v47  ;;  %v261_v25 = vshrl.u32 %v1492_v50, 16 }
  0x28   : > { %1263 = vmatpush3.bf16.msra.mxu0 %v1308_v36  ;;  %v254_v19 = vrot.slane %v253_v7, 4  ;;  %v348_v20 = vrot.slane %v346_v8, 4  ;;  %1229 = vmatmul.mubr.msk.bf16.vlgmr.msra.gmra.mxu1 %vm437_vm3, %v1102_v9  ;;  %v264_v32 = vshll.u32 %v1492_v50, 16  ;;  %v270_v34 = vshll.u32 %v1496_v56, 16 }
  0x29   : > { %v340_v27 = vrot.slane %v339_v12, 4  ;;  %v354_v28 = vrot.slane %v352_v16, 5  ;;  %1264 = vmatprep.subr.bf16.mxu0 %v1310_v1  ;;  %1237 = vmatpush3.bf16.msra.mxu1 %v1401_v23  ;;  %v263_v38 = vrot.slane %v261_v25, 4  ;;  %v274_v41 = vshrl.u32 %v1496_v56, 16 }
  0x2a   : > { %v259_v36 = vsel %vm1418_vm2, %v254_v19, %v258_v55  ;;  %v349_v37 = vor.u32 %v348_v20, %v344_v15  ;;  %1238 = vmatprep.subr.bf16.mxu1 %v1307_v10  ;;  %v266_v23 = vrot.slane %v264_v32, 5  ;;  %v272_v47 = vrot.slane %v270_v34, 5  ;;  %v1542_v55 = vld [vmem:[%s1370_s23 + $0x5c] sm:$0x1] }
  0x2b   : > { %v1099_v43 = vcombine.low %v249_v17, %v259_v36  ;;  %v345_v44 = vsel %vm1418_vm2, %v340_v27, %v344_v15  ;;  %v276_v49 = vrot.slane %v274_v41, 4  ;;  %v280_v51 = vshll.u32 %v1514_v21, 16  ;;  %v1311_v15 = vld [vmem:[%s1709_s1] sm:$0xff]  }
  0x2c   : > { %v350_v48 = vrot.slane %v349_v37, 4  ;;  %v357_v53 = vshrl.u32 %v1524_v35, 16  ;;  %1265 = vmatpush3.bf16.msra.mxu0 %v1310_v1  ;;  %v267_v54 = vor.u32 %v266_v23, %v263_v38  ;;  %v360_v59 = vshll.u32 %v1524_v35, 16 }
  0x2d   : > { %1224 = vmatprep.mubr.msk.bf16.mxu0 %vm437_vm3, %v1099_v43  ;;  %v366_v60 = vshll.u32 %v1531_v42, 16  ;;  %v370_v63 = vshrl.u32 %v1531_v42, 16  ;;  %1266 = vmatprep.subr.bf16.mxu0 %v1312_v26  ;;  %v277_v24 = vor.u32 %v276_v49, %v272_v47  ;;  %v282_v2 = vrot.slane %v280_v51, 5 }
  0x2e   : > { %1239 = vmatpush3.bf16.msra.mxu1 %v1307_v10  ;;  %v355_v0 = vsel %vm1418_vm2, %v350_v48, %v354_v28  ;;  %v359_v7 = vrot.slane %v357_v53, 4  ;;  %v268_v8 = vrot.slane %v267_v54, 4  ;;  %v362_v9 = vrot.slane %v360_v59, 5 }
  0x2f   : > { %v1103_v1 = vcombine.low %v345_v44, %v355_v0  ;;  %1240 = vmatprep.subr.bf16.mxu1 %v1309_v46  ;;  %v368_v12 = vrot.slane %v366_v60, 5  ;;  %v278_v16 = vrot.slane %v277_v24, 4  ;;  %v372_v17 = vrot.slane %v370_v63, 4 }
  0x30   : > { %v376_v19 = vshll.u32 %v1542_v55, 16  ;;  %1267 = vmatpush3.bf16.msra.mxu0 %v1312_v26  ;;  %v1137_v20 = vrot.slane %v1373_v4, 9  ;;  %v767_v25 = vrot.slane %v1423_v39, 5  ;;  %v273_v27 = vsel %vm1418_vm2, %v268_v8, %v272_v47 }
  0x31   : > { %1232 = vmatprep.mubr.msk.bf16.mxu1 %vm437_vm3, %v1103_v1  ;;  %v363_v28 = vor.u32 %v362_v9, %v359_v7  ;;  %v757_v32 = vrot.slane %v1376_v5, 5  ;;  %v283_v26 = vsel %vm1418_vm2, %v278_v16, %v282_v2  ;;  %v373_v34 = vor.u32 %v372_v17, %v368_v12 }
  0x32   : > { %v378_v36 = vrot.slane %v376_v19, 5  ;;  %1241 = vmatpush3.bf16.msra.mxu1 %v1309_v46  ;;  %v1138_v37 = vrot.slane %v1411_v29, 9  ;;  %v1100_v38 = vcombine.low %v273_v27, %v283_v26  ;;  %v1117_v23 = vcombine.low %v1373_v4, %v1376_v5 }
  0x33   : > { %v364_v41 = vrot.slane %v363_v28, 4  ;;  %1242 = vmatprep.subr.bf16.mxu1 %v1311_v15  ;;  %v758_v39 = vsel %vm1555_vm6, %v1137_v20, %v757_v32  ;;  %v759_v43 = vrot.slane %v757_v32, 4  ;;  %v374_v44 = vrot.slane %v373_v34, 4 }
  0x34   : > { %v765_v47 = vsel %vm1555_vm6, %v1138_v37, %v764_v61  ;;  %v766_v46 = vrot.slane %v764_v61, 4  ;;  %1225 = vmatmul.mubr.msk.bf16.gmra.mxu0 %vm437_vm3, %v1100_v38  ;;  %v1139_v4 = vrot.slane %v1454_v3, 9  ;;  %v771_v5 = vrot.slane %v1461_v18, 5 }
  0x35   : > { %v369_v48 = vsel %vm1418_vm2, %v364_v41, %v368_v12  ;;  %v761_v49 = vsel %vm1555_vm6, %v759_v43, %v760_v58  ;;  %v379_v51 = vsel %vm1418_vm2, %v374_v44, %v378_v36  ;;  %v774_v54 = vrot.slane %v1467_v22, 5 }
  0x36   : > { %1243 = vmatpush3.bf16.msra.mxu1 %v1311_v15  ;;  %v1153_v53 = vcombine.low %v758_v39, %v761_v49  ;;  %v768_v61 = vsel %vm1555_vm6, %v766_v46, %v767_v25  ;;  %v1104_v59 = vcombine.low %v369_v48, %v379_v51  ;;  %v772_v6 = vsel %vm1555_vm6, %v1139_v4, %v771_v5 }
  0x37   : > { %v773_v60 = vrot.slane %v771_v5, 4  ;;  %v778_v58 = vrot.slane %v1496_v56, 5  ;;  %v1154_v31 = vcombine.low %v765_v47, %v768_v61  ;;  %v785_v0 = vrot.slane %v1390_v13, 5 }
  0x38   : > { %1268 = vmatprep.mubr.msk.bf16.mxu0 %vm437_vm3, %v1153_v53  ;;  %1233 = vmatmul.mubr.msk.bf16.gmra.mxu1 %vm437_vm3, %v1104_v59  ;;  %v1140_v24 = vrot.slane %v1492_v50, 9  ;;  %v781_v7 = vrot.slane %v1514_v21, 5  ;;  %v788_v1 = vrot.slane %v1393_v14, 5  ;;  %v1141_v8 = vrot.slane %v1386_v11, 9 }
  0x39   : > { %v775_v63 = vsel %vm1555_vm6, %v773_v60, %v774_v54  ;;  %1244 = vmatprep.mubr.msk.bf16.mxu1 %vm437_vm3, %v1117_v23  ;;  %v780_v2 = vrot.slane %v778_v58, 4  ;;  %v787_v9 = vrot.slane %v785_v0, 4  ;;  %v1118_v12 = vcombine.low %v1411_v29, %v1414_v30 }
  0x3a   : > { %v1155_v22 = vcombine.low %v772_v6, %v775_v63  ;;  %v1119_v15 = vcombine.low %v1454_v3, %v1461_v18  ;;  %v779_v16 = vsel %vm1555_vm6, %v1140_v24, %v778_v58  ;;  %v792_v14 = vrot.slane %v1440_v57, 5 }
  0x3b   : > { %v782_v21 = vsel %vm1555_vm6, %v780_v2, %v781_v7  ;;  %v786_v17 = vsel %vm1555_vm6, %v1141_v8, %v785_v0  ;;  %v789_v29 = vsel %vm1555_vm6, %v787_v9, %v788_v1  ;;  %v799_v30 = vrot.slane %v1481_v40, 5 }
  0x3c   : > { %1269 = vmatmul.mubr.msk.bf16.vlgmr.msra.gmra.mxu0 %vm437_vm3, %v1154_v31  ;;  %v1156_v3 = vcombine.low %v779_v16, %v782_v21  ;;  %v1157_v18 = vcombine.low %v786_v17, %v789_v29  ;;  %v1142_v19 = vrot.slane %v1436_v52, 9  ;;  %v794_v20 = vrot.slane %v792_v14, 4 }
  0x3d   : > { %1272 = vmatprep.mubr.msk.bf16.mxu0 %vm437_vm3, %v1155_v22  ;;  %v795_v25 = vrot.slane %v1448_v62, 5  ;;  %v1143_v27 = vrot.slane %v1474_v33, 9  ;;  %v801_v28 = vrot.slane %v799_v30, 4  ;;  %v802_v32 = vrot.slane %v1486_v45, 5 }
  0x3e   : > { %v1120_v26 = vcombine.low %v1492_v50, %v1496_v56  ;;  %v1121_v34 = vcombine.low %v1386_v11, %v1390_v13  ;;  %v793_v36 = vsel %vm1555_vm6, %v1142_v19, %v792_v14  ;;  %v806_v37 = vrot.slane %v1531_v42, 5 }
  0x3f   : > { %v796_v62 = vsel %vm1555_vm6, %v794_v20, %v795_v25  ;;  %v800_v45 = vsel %vm1555_vm6, %v1143_v27, %v799_v30  ;;  %v803_v50 = vsel %vm1555_vm6, %v801_v28, %v802_v32  ;;  %v1144_v13 = vrot.slane %v1524_v35, 9 }
  0x40   : > { %1245 = vmatmul.mubr.msk.bf16.vlgmr.msra.gmra.mxu1 %vm437_vm3, %v1118_v12  ;;  %v1158_v56 = vcombine.low %v793_v36, %v796_v62  ;;  %v1159_v11 = vcombine.low %v800_v45, %v803_v50  ;;  %v808_v38 = vrot.slane %v806_v37, 4  ;;  %v809_v41 = vrot.slane %v1542_v55, 5 }
  0x41   : > { %1248 = vmatprep.mubr.msk.bf16.mxu1 %vm437_vm3, %v1119_v15  ;;  %v1122_v39 = vcombine.low %v1436_v52, %v1440_v57  ;;  %v1123_v43 = vcombine.low %v1474_v33, %v1481_v40  ;;  %v807_v44 = vsel %vm1555_vm6, %v1144_v13, %v806_v37  ;;  %v1124_v52 = vcombine.low %v1524_v35, %v1531_v42 }
  0x42   : > { %v810_v23 = vsel %vm1555_vm6, %v808_v38, %v809_v41 }
  0x43   : > { %v1160_v47 = vcombine.low %v807_v44, %v810_v23 }
  0x44   : > { %1273 = vmatmul.mubr.msk.bf16.gmra.mxu0 %vm437_vm3, %v1156_v3 }
  0x45   : > { %1276 = vmatprep.mubr.msk.bf16.mxu0 %vm437_vm3, %v1157_v18 }
  0x48   : > { %1249 = vmatmul.mubr.msk.bf16.gmra.mxu1 %vm437_vm3, %v1120_v26 }
  0x49   : > { %1252 = vmatprep.mubr.msk.bf16.mxu1 %vm437_vm3, %v1121_v34 }
  0x4c   : > { %1277 = vmatmul.mubr.msk.bf16.gmra.mxu0 %vm437_vm3, %v1158_v56 }
  0x4d   : > { %1280 = vmatprep.mubr.msk.bf16.mxu0 %vm437_vm3, %v1159_v11 }
  0x50   : > { %1253 = vmatmul.mubr.msk.bf16.gmra.mxu1 %vm437_vm3, %v1122_v39 }
  0x51   : > { %1256 = vmatprep.mubr.msk.bf16.mxu1 %vm437_vm3, %v1123_v43 }
  0x54   : > { %1281 = vmatmul.mubr.msk.bf16.gmra.mxu0 %vm437_vm3, %v1160_v47 }
  0x58   : > { %1257 = vmatmul.mubr.msk.bf16.gmra.mxu1 %vm437_vm3, %v1124_v52 }
  0xe3   : > { %v1222_v57 = vpop.f32.mrf.mxu0 }
  0xe5   : > { %v496_v40 = vpop.f32.mrf.mxu0 }
  0xe7   : > { %v1223_v10 = vpop.f32.mrf.mxu0 }
  0xe8   : > { %v1230_v33 = vpop.f32.mrf.mxu1 }
  0xe9   : > { %v499_v48 = vpop.f32.mrf.mxu0 }
  0xea   : > { %v1662_v55 = vpop.f32.mrf.mxu1 }
  0xec   : > { %v1664_v46 = vpop.f32.mrf.mxu1 }
  0xee   : > { %v1666_v49 = vpop.f32.mrf.mxu1 }
  0xf4   : > { %v1226_v4 = vpop.f32.mrf.mxu0 }
  0xf6   : > { %v512_v5 = vpop.f32.mrf.mxu0 }
  0xf8   : > { %v1668_v51 = vpop.f32.mrf.mxu1  ;;  %v1227_v35 = vpop.f32.mrf.mxu0 }
  0xfa   : > { %v1670_v42 = vpop.f32.mrf.mxu1  ;;  %v515_v53 = vpop.f32.mrf.mxu0 }
  0xfc   : > { %v1672_v61 = vpop.f32.mrf.mxu1  ;;  %v1270_v54 = vpop.f32.mrf.mxu0 }
  0xfe   : > { %v1674_v59 = vpop.f32.mrf.mxu1  ;;  %v926_v6 = vpop.f32.mrf.mxu0 }
 0x100   : > { %v1246_v60 = vpop.f32.mrf.mxu1  ;;  %v1271_v58 = vpop.f32.mrf.mxu0 }
 0x101   : > { %v690_v31 = vadd.f32 %v1246_v60, %v1222_v57 }
 0x102   : > { %v681_v63 = vpop.f32.mrf.mxu1  ;;  %v929_v0 = vpop.f32.mrf.mxu0 }
 0x103   : > { %v991_v22 = vadd.f32 %v1270_v54, %v690_v31  ;;  %v682_v24 = vadd.f32 %v681_v63, %v496_v40 }
 0x104   : > { %v1247_v2 = vpop.f32.mrf.mxu1  ;;  %v1274_v7 = vpop.f32.mrf.mxu0 }
 0x105   : > { %1007 = vst [vmem:[%s1680_s17 + $0x10] sm:$0xff] %v991_v22  ;;  %v989_v1 = vadd.f32 %v926_v6, %v682_v24  ;;  %v693_v8 = vadd.f32 %v1247_v2, %v1223_v10 }
 0x106   : > { %v684_v9 = vpop.f32.mrf.mxu1  ;;  %v942_v12 = vpop.f32.mrf.mxu0 }
 0x107   : > { %1005 = vst [vmem:[%s1680_s17] sm:$0xff] %v989_v1  ;;  %v992_v15 = vadd.f32 %v1271_v58, %v693_v8  ;;  %v685_v16 = vadd.f32 %v684_v9, %v499_v48 }
 0x108   : > { %v1250_v21 = vpop.f32.mrf.mxu1  ;;  %v1275_v14 = vpop.f32.mrf.mxu0 }
 0x109   : > { %1008 = vst [vmem:[%s1680_s17 + $0x18] sm:$0xff] %v992_v15  ;;  %v990_v17 = vadd.f32 %v929_v0, %v685_v16  ;;  %v706_v29 = vadd.f32 %v1250_v21, %v1226_v4 }
 0x10a   : > { %v697_v30 = vpop.f32.mrf.mxu1  ;;  %v945_v3 = vpop.f32.mrf.mxu0 }
 0x10b   : > { %1006 = vst [vmem:[%s1680_s17 + $0x8] sm:$0xff] %v990_v17  ;;  %v995_v18 = vadd.f32 %v1274_v7, %v706_v29  ;;  %v698_v19 = vadd.f32 %v697_v30, %v512_v5 }
 0x10c   : > { %v1251_v20 = vpop.f32.mrf.mxu1  ;;  %v1278_v25 = vpop.f32.mrf.mxu0 }
 0x10d   : > { %1011 = vst [vmem:[%s1680_s17 + $0x30] sm:$0xff] %v995_v18  ;;  %v993_v27 = vadd.f32 %v942_v12, %v698_v19  ;;  %v709_v28 = vadd.f32 %v1251_v20, %v1227_v35 }
 0x10e   : > { %v700_v32 = vpop.f32.mrf.mxu1  ;;  %v958_v26 = vpop.f32.mrf.mxu0 }
 0x10f   : > { %1009 = vst [vmem:[%s1680_s17 + $0x20] sm:$0xff] %v993_v27  ;;  %v996_v34 = vadd.f32 %v1275_v14, %v709_v28  ;;  %v701_v36 = vadd.f32 %v700_v32, %v515_v53 }
 0x110   : > { %v1254_v62 = vpop.f32.mrf.mxu1  ;;  %v1279_v37 = vpop.f32.mrf.mxu0 }
 0x111   : > { %1012 = vst [vmem:[%s1680_s17 + $0x38] sm:$0xff] %v996_v34  ;;  %v994_v45 = vadd.f32 %v945_v3, %v701_v36  ;;  %v722_v50 = vadd.f32 %v1254_v62, %v1230_v33 }
 0x112   : > { %v713_v56 = vpop.f32.mrf.mxu1  ;;  %v961_v11 = vpop.f32.mrf.mxu0 }
 0x113   : > { %1010 = vst [vmem:[%s1680_s17 + $0x28] sm:$0xff] %v994_v45  ;;  %v999_v13 = vadd.f32 %v1278_v25, %v722_v50  ;;  %v714_v38 = vadd.f32 %v713_v56, %v1662_v55 }
 0x114   : > { %v1255_v41 = vpop.f32.mrf.mxu1  ;;  %v1282_v39 = vpop.f32.mrf.mxu0 }
 0x115   : > { %1015 = vst [vmem:[%s1680_s17 + $0x50] sm:$0xff] %v999_v13  ;;  %v997_v43 = vadd.f32 %v958_v26, %v714_v38  ;;  %v725_v44 = vadd.f32 %v1255_v41, %v1664_v46 }
 0x116   : > { %v716_v23 = vpop.f32.mrf.mxu1  ;;  %v974_v33 = vpop.f32.mrf.mxu0 }
 0x117   : > { %1013 = vst [vmem:[%s1680_s17 + $0x40] sm:$0xff] %v997_v43  ;;  %v1000_v47 = vadd.f32 %v1279_v37, %v725_v44  ;;  %v717_v52 = vadd.f32 %v716_v23, %v1666_v49 }
 0x118   : > { %v1258_v57 = vpop.f32.mrf.mxu1  ;;  %v1283_v5 = vpop.f32.mrf.mxu0 }
 0x119   : > { %1016 = vst [vmem:[%s1680_s17 + $0x58] sm:$0xff] %v1000_v47  ;;  %v998_v40 = vadd.f32 %v961_v11, %v717_v52  ;;  %v738_v55 = vadd.f32 %v1258_v57, %v1668_v51 }
 0x11a   : > { %v729_v10 = vpop.f32.mrf.mxu1  ;;  %v977_v60 = vpop.f32.mrf.mxu0 }
 0x11b   : > { %1014 = vst [vmem:[%s1680_s17 + $0x48] sm:$0xff] %v998_v40  ;;  %v1003_v48 = vadd.f32 %v1282_v39, %v738_v55  ;;  %v730_v46 = vadd.f32 %v729_v10, %v1670_v42 }
 0x11c   : > { %v1259_v4 = vpop.f32.mrf.mxu1 }
 0x11d   : > { %1019 = vst [vmem:[%s1680_s17 + $0x70] sm:$0xff] %v1003_v48  ;;  %v1001_v35 = vadd.f32 %v974_v33, %v730_v46  ;;  %v741_v49 = vadd.f32 %v1259_v4, %v1672_v61 }
 0x11e   : > { %v732_v53 = vpop.f32.mrf.mxu1 }
 0x11f   : > { %1017 = vst [vmem:[%s1680_s17 + $0x60] sm:$0xff] %v1001_v35  ;;  %v1004_v54 = vadd.f32 %v1283_v5, %v741_v49  ;;  %v733_v6 = vadd.f32 %v732_v53, %v1674_v59 }
 0x121   : > { %1020 = vst [vmem:[%s1680_s17 + $0x78] sm:$0xff] %v1004_v54  ;;  %v1002_v51 = vadd.f32 %v977_v60, %v733_v6 }
 0x123   : > { %1018 = vst [vmem:[%s1680_s17 + $0x68] sm:$0xff] %v1002_v51 }
 0x124 PF: > { %s12_s9 = sadd.s32 1, %s1327_s9  }
 0x125   : > { %p9_p4 = scmp.ge.s32.totalorder %s12_s9, 4  }
 0x127   :  { %11 = sbr.rel (!%p9_p4) target bundleno = 1 (0x1), region = 60 }

</bundles_post_ra>
